<compile_context>
chip_gen: v6e
topology: v6e:2x2x1
jax: 0.10.0
libtpu: 0.0.40
codegen_flags: <defaults>
</compile_context>

<pallas_src>
import functools

import numpy as np
import jax
import jax.numpy as jnp
from jax.experimental import pallas as pl
from jax.experimental.pallas import tpu as pltpu


# ----------------------------------------------------------------------------
# Fused kernel: one grid step == TB batch elements, everything VMEM-resident.
# ----------------------------------------------------------------------------
def _res_block_kernel(x_ref, w1_ref, b1_ref, w2_ref, b2_ref, *rest,
                      L, TB, has_shortcut, mxu_dtype):
    if has_shortcut:
        ws_ref, bs_ref, o_ref = rest
    else:
        (o_ref,) = rest

    cin = x_ref.shape[-1]
    cout = o_ref.shape[1]

    def shifted_cat(a, c):
        # (TB, L, c) -> (TB*L, 3c) with columns [x[l-1] | x[l] | x[l+1]] and zero
        # rows at the sequence boundaries (k=3, pad=1 im2col folded into K).
        z = jnp.zeros((TB, 1, c), a.dtype)
        left = jnp.concatenate([z, a[:, :L - 1, :]], axis=1)
        right = jnp.concatenate([a[:, 1:, :], z], axis=1)
        return jnp.concatenate([left, a, right], axis=-1).reshape(TB * L, 3 * c)

    def mm(a, w_ref):
        # MXU matmul, optional bf16 operands, always f32 accumulation.
        return jnp.dot(a.astype(mxu_dtype), w_ref[...],
                       preferred_element_type=jnp.float32)

    xt = x_ref[...]                                          # (TB, L, Cin), f32

    # conv1 (k=3, pad=1) as a single (TB*L, 3Cin)@(3Cin, Cout) matmul + bias + ReLU.
    h = jnp.maximum(mm(shifted_cat(xt, cin), w1_ref) + b1_ref[...], 0.0)

    # conv2 (k=3, pad=1) on h: same tap-folded single matmul.
    y = mm(shifted_cat(h.reshape(TB, L, cout), cout), w2_ref) + b2_ref[...]

    # Shortcut: 1x1 conv (Cin != Cout) or identity -- selected at trace time,
    # so the no-shortcut path costs nothing extra.
    x_flat = xt.reshape(TB * L, cin)
    if has_shortcut:
        z = mm(x_flat, ws_ref) + bs_ref[...]
    else:
        z = x_flat                                           # requires Cin == Cout

    out = jnp.maximum(y + z, 0.0)                            # (TB*L, Cout), f32
    # Store directly in NCL orientation (no wrapper transpose): small XLU transpose.
    o_ref[...] = jnp.transpose(out.reshape(TB, L, cout), (0, 2, 1)).astype(o_ref.dtype)


# ----------------------------------------------------------------------------
# Wrapper: matches PyTorch ResBlockConv.forward (NCL in, NCL out, act = ReLU).
# ----------------------------------------------------------------------------
def res_block_conv(x, params, *, mxu_dtype=jnp.float32, rows_per_step=512):
    """x: (B, Cin, L) float32 -> (B, Cout, L). One fused pallas_call."""
    B, Cin, L = x.shape
    w1 = params["w1"]                                        # (Cout, Cin, 3)
    Cout = w1.shape[0]
    has_shortcut = "ws" in params
    if not has_shortcut:
        assert Cin == Cout, "identity shortcut requires in_dim == out_dim"

    # Batch tile: flatten (TB, L) into the matmul M dim, ~rows_per_step rows/step.
    TB = max(1, min(B, rows_per_step // max(L, 1)))
    nsteps = (B + TB - 1) // TB
    Bp = nsteps * TB

    # Only remaining wrapper layout op: NCL -> NLC on the input.
    x_t = jnp.transpose(x, (0, 2, 1)).astype(jnp.float32)    # (B, L, Cin)
    if Bp != B:
        x_t = jnp.pad(x_t, ((0, Bp - B), (0, 0), (0, 0)))

    # Tap-folded weights: K index = tap * C + channel; tap 0 pairs with x[l-1].
    w1c = jnp.transpose(w1, (2, 1, 0)).reshape(3 * Cin, Cout).astype(mxu_dtype)
    w2c = jnp.transpose(params["w2"], (2, 1, 0)).reshape(3 * Cout, Cout).astype(mxu_dtype)
    b1 = params["b1"].reshape(1, Cout).astype(jnp.float32)
    b2 = params["b2"].reshape(1, Cout).astype(jnp.float32)

    inputs = [x_t, w1c, b1, w2c, b2]
    in_specs = [
        pl.BlockSpec((TB, L, Cin), lambda i: (i, 0, 0)),
        pl.BlockSpec((3 * Cin, Cout), lambda i: (0, 0)),
        pl.BlockSpec((1, Cout), lambda i: (0, 0)),
        pl.BlockSpec((3 * Cout, Cout), lambda i: (0, 0)),
        pl.BlockSpec((1, Cout), lambda i: (0, 0)),
    ]
    if has_shortcut:
        ws = jnp.transpose(params["ws"][:, :, 0]).astype(mxu_dtype)   # (Cin, Cout)
        bs = params["bs"].reshape(1, Cout).astype(jnp.float32)
        inputs += [ws, bs]
        in_specs += [pl.BlockSpec((Cin, Cout), lambda i: (0, 0)),
                     pl.BlockSpec((1, Cout), lambda i: (0, 0))]

    flops = 2 * Bp * L * (3 * Cin * Cout + 3 * Cout * Cout
                          + (Cin * Cout if has_shortcut else 0))
    bytes_accessed = 4 * (Bp * L * Cin + Bp * Cout * L + 3 * Cin * Cout
                          + 3 * Cout * Cout + 2 * Cout
                          + ((Cin + 1) * Cout if has_shortcut else 0))

    y = pl.pallas_call(
        functools.partial(_res_block_kernel, L=L, TB=TB,
                          has_shortcut=has_shortcut, mxu_dtype=mxu_dtype),
        out_shape=jax.ShapeDtypeStruct((Bp, Cout, L), jnp.float32),
        grid=(nsteps,),
        in_specs=in_specs,
        out_specs=pl.BlockSpec((TB, Cout, L), lambda i: (i, 0, 0)),
        compiler_params=pltpu.CompilerParams(
            dimension_semantics=("parallel",),
            allow_input_fusion=[True] + [False] * (len(inputs) - 1)),
        cost_estimate=pl.CostEstimate(flops=flops, transcendentals=0,
                                      bytes_accessed=bytes_accessed),
    )(*inputs)

    return y[:B] if Bp != B else y


# ----------------------------------------------------------------------------
# Pure-JAX reference (exact PyTorch semantics) for correctness checking.
# ----------------------------------------------------------------------------
def _conv1d_ref(x, w, b, pad):
    y = jax.lax.conv_general_dilated(
        x, w, window_strides=(1,), padding=[(pad, pad)],
        dimension_numbers=("NCH", "OIH", "NCH"),
        precision=jax.lax.Precision.HIGHEST)
    return y + b[None, :, None]


def _ref_res_block(x, params):
    h = jax.nn.relu(_conv1d_ref(x, params["w1"], params["b1"], 1))
    y = _conv1d_ref(h, params["w2"], params["b2"], 1)
    z = _conv1d_ref(x, params["ws"], params["bs"], 0) if "ws" in params else x
    return jax.nn.relu(y + z)


# ----------------------------------------------------------------------------
# Deterministic parameter init (shapes per the PyTorch __init__).
# ----------------------------------------------------------------------------
def init_params(key, cin, cout):
    ks = jax.random.split(key, 6)
    p = {
        "w1": jax.random.normal(ks[0], (cout, cin, 3), jnp.float32) * 0.1,
        "b1": jax.random.normal(ks[1], (cout,), jnp.float32) * 0.1,
        "w2": jax.random.normal(ks[2], (cout, cout, 3), jnp.float32) * 0.1,
        "b2": jax.random.normal(ks[3], (cout,), jnp.float32) * 0.1,
    }
    if cin != cout:
        p["ws"] = jax.random.normal(ks[4], (cout, cin, 1), jnp.float32) * 0.1
        p["bs"] = jax.random.normal(ks[5], (cout,), jnp.float32) * 0.1
    return p


if __name__ == "__main__":
    key = jax.random.PRNGKey(0)
    kp1, kp2, kx = jax.random.split(key, 3)

    B, Cin, Cout, L = 2, 6, 32, 16
    params_proj = init_params(kp1, Cin, Cout)     # Cin != Cout -> 1x1 conv shortcut
    params_same = init_params(kp2, Cout, Cout)    # Cin == Cout -> identity shortcut
    x = jax.random.normal(kx, (B, Cin, L), jnp.float32)

    fwd = jax.jit(res_block_conv)

    # Block with projection shortcut (f32 MXU operands, tight tolerance).
    y = jax.block_until_ready(fwd(x, params_proj))
    assert y.shape == (B, Cout, L), y.shape
    y_ref = _ref_res_block(x, params_proj)
    np.testing.assert_allclose(np.asarray(y), np.asarray(y_ref), rtol=1e-4, atol=1e-4)

    # Block with identity shortcut (chained on the previous output).
    h = jax.block_until_ready(fwd(y, params_same))
    assert h.shape == (B, Cout, L), h.shape
    h_ref = _ref_res_block(y_ref, params_same)
    np.testing.assert_allclose(np.asarray(h), np.asarray(h_ref), rtol=1e-4, atol=1e-4)

    # bf16 MXU-operand fast path (v6e/v7x), f32 accumulation -> looser tolerance.
    fwd_bf16 = jax.jit(functools.partial(res_block_conv, mxu_dtype=jnp.bfloat16))
    yb = jax.block_until_ready(fwd_bf16(x, params_proj))
    np.testing.assert_allclose(np.asarray(yb), np.asarray(y_ref), rtol=5e-2, atol=5e-2)

    assert bool(jnp.all(jnp.isfinite(h)))
    print("KERNEL_OK")
</pallas_src>

<mosaic_0001>
module attributes {stable_mosaic.version = 11 : i64} {
  func.func @_res_block_kernel(%arg0: i32, %arg1: memref<2x16x6xf32, #tpu.memory_space<vmem>>, %arg2: memref<18x32xf32, #tpu.memory_space<vmem>>, %arg3: memref<1x32xf32, #tpu.memory_space<vmem>>, %arg4: memref<96x32xf32, #tpu.memory_space<vmem>>, %arg5: memref<1x32xf32, #tpu.memory_space<vmem>>, %arg6: memref<6x32xf32, #tpu.memory_space<vmem>>, %arg7: memref<1x32xf32, #tpu.memory_space<vmem>>, %arg8: memref<2x32x16xf32, #tpu.memory_space<vmem>>) attributes {dimension_semantics = [#tpu.dimension_semantics<parallel>], iteration_bounds = array<i64: 1>, scalar_prefetch = 0 : i64, scratch_operands = 0 : i64, tpu.core_type = #tpu.core_type<tc>, window_params = [{transform_indices = @transform_0, window_bounds = array<i64: 2, 16, 6>}, {pipeline_mode = #tpu.pipeline_mode<synchronous>, transform_indices = @transform_1, window_bounds = array<i64: 18, 32>}, {pipeline_mode = #tpu.pipeline_mode<synchronous>, transform_indices = @transform_2, window_bounds = array<i64: 1, 32>}, {pipeline_mode = #tpu.pipeline_mode<synchronous>, transform_indices = @transform_3, window_bounds = array<i64: 96, 32>}, {pipeline_mode = #tpu.pipeline_mode<synchronous>, transform_indices = @transform_4, window_bounds = array<i64: 1, 32>}, {pipeline_mode = #tpu.pipeline_mode<synchronous>, transform_indices = @transform_5, window_bounds = array<i64: 6, 32>}, {pipeline_mode = #tpu.pipeline_mode<synchronous>, transform_indices = @transform_6, window_bounds = array<i64: 1, 32>}, {transform_indices = @transform_7, window_bounds = array<i64: 2, 32, 16>}]} {
    %c0 = arith.constant 0 : index
    %c0_0 = arith.constant 0 : index
    %c0_1 = arith.constant 0 : index
    %0 = vector.load %arg1[%c0, %c0_0, %c0_1] : memref<2x16x6xf32, #tpu.memory_space<vmem>>, vector<2x16x6xf32>
    %cst = arith.constant 0.000000e+00 : f32
    %1 = vector.broadcast %cst : f32 to vector<2x1x6xf32>
    %2 = vector.extract_strided_slice %0 {offsets = [0, 0, 0], sizes = [2, 15, 6], strides = [1, 1, 1]} : vector<2x16x6xf32> to vector<2x15x6xf32>
    %3 = tpu.concatenate %1, %2 in 1 : vector<2x1x6xf32>, vector<2x15x6xf32> -> vector<2x16x6xf32>
    %4 = vector.extract_strided_slice %0 {offsets = [0, 1, 0], sizes = [2, 15, 6], strides = [1, 1, 1]} : vector<2x16x6xf32> to vector<2x15x6xf32>
    %5 = tpu.concatenate %4, %1 in 1 : vector<2x15x6xf32>, vector<2x1x6xf32> -> vector<2x16x6xf32>
    %6 = tpu.concatenate %3, %0, %5 in 2 : vector<2x16x6xf32>, vector<2x16x6xf32>, vector<2x16x6xf32> -> vector<2x16x18xf32>
    %7 = vector.shape_cast %6 : vector<2x16x18xf32> to vector<32x18xf32>
    %c0_2 = arith.constant 0 : index
    %c0_3 = arith.constant 0 : index
    %8 = vector.load %arg2[%c0_2, %c0_3] : memref<18x32xf32, #tpu.memory_space<vmem>>, vector<18x32xf32>
    %cst_4 = arith.constant dense<0.000000e+00> : vector<32x32xf32>
    %9 = tpu.matmul %7, %8, %cst_4 {dimension_numbers = #tpu.dot_dimension_numbers<[1], [0], [0], [1], [0, 0, 1, 1], [], []>} : vector<32x18xf32>, vector<18x32xf32>, vector<32x32xf32> -> vector<32x32xf32>
    %c0_5 = arith.constant 0 : index
    %c0_6 = arith.constant 0 : index
    %10 = vector.load %arg3[%c0_5, %c0_6] : memref<1x32xf32, #tpu.memory_space<vmem>>, vector<1x32xf32>
    %11 = vector.broadcast %10 : vector<1x32xf32> to vector<32x32xf32>
    %12 = arith.addf %9, %11 : vector<32x32xf32>
    %cst_7 = arith.constant 0.000000e+00 : f32
    %13 = vector.broadcast %cst_7 : f32 to vector<32x32xf32>
    %14 = arith.maximumf %12, %13 : vector<32x32xf32>
    %15 = vector.shape_cast %14 : vector<32x32xf32> to vector<2x16x32xf32>
    %cst_8 = arith.constant 0.000000e+00 : f32
    %16 = vector.broadcast %cst_8 : f32 to vector<2x1x32xf32>
    %17 = vector.extract_strided_slice %15 {offsets = [0, 0, 0], sizes = [2, 15, 32], strides = [1, 1, 1]} : vector<2x16x32xf32> to vector<2x15x32xf32>
    %18 = tpu.concatenate %16, %17 in 1 : vector<2x1x32xf32>, vector<2x15x32xf32> -> vector<2x16x32xf32>
    %19 = vector.extract_strided_slice %15 {offsets = [0, 1, 0], sizes = [2, 15, 32], strides = [1, 1, 1]} : vector<2x16x32xf32> to vector<2x15x32xf32>
    %20 = tpu.concatenate %19, %16 in 1 : vector<2x15x32xf32>, vector<2x1x32xf32> -> vector<2x16x32xf32>
    %21 = tpu.concatenate %18, %15, %20 in 2 : vector<2x16x32xf32>, vector<2x16x32xf32>, vector<2x16x32xf32> -> vector<2x16x96xf32>
    %22 = vector.shape_cast %21 : vector<2x16x96xf32> to vector<32x96xf32>
    %c0_9 = arith.constant 0 : index
    %c0_10 = arith.constant 0 : index
    %23 = vector.load %arg4[%c0_9, %c0_10] : memref<96x32xf32, #tpu.memory_space<vmem>>, vector<96x32xf32>
    %cst_11 = arith.constant dense<0.000000e+00> : vector<32x32xf32>
    %24 = tpu.matmul %22, %23, %cst_11 {dimension_numbers = #tpu.dot_dimension_numbers<[1], [0], [0], [1], [0, 0, 1, 1], [], []>} : vector<32x96xf32>, vector<96x32xf32>, vector<32x32xf32> -> vector<32x32xf32>
    %c0_12 = arith.constant 0 : index
    %c0_13 = arith.constant 0 : index
    %25 = vector.load %arg5[%c0_12, %c0_13] : memref<1x32xf32, #tpu.memory_space<vmem>>, vector<1x32xf32>
    %26 = vector.broadcast %25 : vector<1x32xf32> to vector<32x32xf32>
    %27 = arith.addf %24, %26 : vector<32x32xf32>
    %28 = vector.shape_cast %0 : vector<2x16x6xf32> to vector<32x6xf32>
    %c0_14 = arith.constant 0 : index
    %c0_15 = arith.constant 0 : index
    %29 = vector.load %arg6[%c0_14, %c0_15] : memref<6x32xf32, #tpu.memory_space<vmem>>, vector<6x32xf32>
    %cst_16 = arith.constant dense<0.000000e+00> : vector<32x32xf32>
    %30 = tpu.matmul %28, %29, %cst_16 {dimension_numbers = #tpu.dot_dimension_numbers<[1], [0], [0], [1], [0, 0, 1, 1], [], []>} : vector<32x6xf32>, vector<6x32xf32>, vector<32x32xf32> -> vector<32x32xf32>
    %c0_17 = arith.constant 0 : index
    %c0_18 = arith.constant 0 : index
    %31 = vector.load %arg7[%c0_17, %c0_18] : memref<1x32xf32, #tpu.memory_space<vmem>>, vector<1x32xf32>
    %32 = vector.broadcast %31 : vector<1x32xf32> to vector<32x32xf32>
    %33 = arith.addf %30, %32 : vector<32x32xf32>
    %34 = arith.addf %27, %33 : vector<32x32xf32>
    %cst_19 = arith.constant 0.000000e+00 : f32
    %35 = vector.broadcast %cst_19 : f32 to vector<32x32xf32>
    %36 = arith.maximumf %34, %35 : vector<32x32xf32>
    %37 = vector.shape_cast %36 : vector<32x32xf32> to vector<2x16x32xf32>
    %38 = tpu.transpose %37, [0, 2, 1] : vector<2x16x32xf32> -> vector<2x32x16xf32>
    %c0_20 = arith.constant 0 : index
    %c0_21 = arith.constant 0 : index
    %c0_22 = arith.constant 0 : index
    %39 = vector.load %arg8[%c0_20, %c0_21, %c0_22] : memref<2x32x16xf32, #tpu.memory_space<vmem>>, vector<2x32x16xf32>
    tpu.vector_store %arg8[%c0_20, %c0_21, %c0_22], %38 {strides = array<i32>} : memref<2x32x16xf32, #tpu.memory_space<vmem>>, vector<2x32x16xf32>,
    return
  }
  func.func @transform_0(%arg0: i32) -> (i32, i32, i32) {
    %c0_i32 = arith.constant 0 : i32
    %c0_i32_0 = arith.constant 0 : i32
    %c0_i32_1 = arith.constant 0 : i32
    return %arg0, %c0_i32, %c0_i32_0 : i32, i32, i32
  }
  func.func @transform_1(%arg0: i32) -> (i32, i32) {
    %c0_i32 = arith.constant 0 : i32
    %c0_i32_0 = arith.constant 0 : i32
    %c0_i32_1 = arith.constant 0 : i32
    return %c0_i32, %c0_i32_0 : i32, i32
  }
  func.func @transform_2(%arg0: i32) -> (i32, i32) {
    %c0_i32 = arith.constant 0 : i32
    %c0_i32_0 = arith.constant 0 : i32
    %c0_i32_1 = arith.constant 0 : i32
    return %c0_i32, %c0_i32_0 : i32, i32
  }
  func.func @transform_3(%arg0: i32) -> (i32, i32) {
    %c0_i32 = arith.constant 0 : i32
    %c0_i32_0 = arith.constant 0 : i32
    %c0_i32_1 = arith.constant 0 : i32
    return %c0_i32, %c0_i32_0 : i32, i32
  }
  func.func @transform_4(%arg0: i32) -> (i32, i32) {
    %c0_i32 = arith.constant 0 : i32
    %c0_i32_0 = arith.constant 0 : i32
    %c0_i32_1 = arith.constant 0 : i32
    return %c0_i32, %c0_i32_0 : i32, i32
  }
  func.func @transform_5(%arg0: i32) -> (i32, i32) {
    %c0_i32 = arith.constant 0 : i32
    %c0_i32_0 = arith.constant 0 : i32
    %c0_i32_1 = arith.constant 0 : i32
    return %c0_i32, %c0_i32_0 : i32, i32
  }
  func.func @transform_6(%arg0: i32) -> (i32, i32) {
    %c0_i32 = arith.constant 0 : i32
    %c0_i32_0 = arith.constant 0 : i32
    %c0_i32_1 = arith.constant 0 : i32
    return %c0_i32, %c0_i32_0 : i32, i32
  }
  func.func @transform_7(%arg0: i32) -> (i32, i32, i32) {
    %c0_i32 = arith.constant 0 : i32
    %c0_i32_0 = arith.constant 0 : i32
    %c0_i32_1 = arith.constant 0 : i32
    return %arg0, %c0_i32, %c0_i32_0 : i32, i32, i32
  }
}

</mosaic_0001>

<bundles_post_ra>
// kernel: res_block_conv.2
= control target key start
LH: loop header
LB: loop body
LE: loop exit
PB: predicated region body
PF: predicated region fallthrough
CT: control target
= control target key end

     0   :  { %vm69_vm0 = vcmask 1046528   ;;  %s704_s28 = smov 6   ;;  %vm139_vm1 = vcmask 1041408   ;;  %s705_s14 = smov 12   ;;  %vm56_vm2 = vcmask 1040384   ;;  %vm106_vm3 = vcmask 48128   ;;  %s917_s0 = inlined_call_operand.vmem [shape: f32[18,32], index: 0, kind: input, shape index: {}]   ;;  %s918_s1 = inlined_call_operand.vmem [shape: f32[1,32], index: 1, kind: input, shape index: {}]   ;;  %s919_s2 = inlined_call_operand.vmem [shape: f32[96,32], index: 2, kind: input, shape index: {}]   ;;  %s920_s3 = inlined_call_operand.vmem [shape: f32[1,32], index: 3, kind: input, shape index: {}]   ;;  %s921_s4 = inlined_call_operand.vmem [shape: f32[6,32], index: 4, kind: input, shape index: {}]   ;;  %s922_s5 = inlined_call_operand.vmem [shape: f32[1,32], index: 5, kind: input, shape index: {}]   ;;  %s923_s6 = inlined_call_operand.vmem [shape: f32[2,6,16], index: 6, kind: input, shape index: {}]   ;;  %s924_s7 = inlined_call_operand.vmem [shape: f32[2,32,16], index: 7, kind: output, shape index: {}]  }
   0x1   :  { %v751_v0 = vld [vmem:[%s923_s6] sm:$0xff]  ;;  %v756_v1 = vld [vmem:[%s923_s6 + $0x8] sm:$0xff]  ;;  %v118_v4 = vld [vmem:[%s917_s0 + $0x10] sm:$0x3]  ;;  %vm111_vm4 = vcmask 97280   ;;  %vm126_vm5 = vcmask 146432  }
   0x2   :  { %80 = vrot.lane.b32.xlu0 %v751_v0, %s704_s28  ;;  %v70_v2 = vrot.slane %v751_v0, 1  ;;  %v71_v3 = vrot.slane %v756_v1, 1  ;;  %v768_v6 = vld [vmem:[%s923_s6 + $0x10] sm:$0xff]  ;;  %v773_v7 = vld [vmem:[%s923_s6 + $0x18] sm:$0xff]  ;;  %v117_v8 = vld [vmem:[%s917_s0 + $0x8] sm:$0xff]  ;;  %649 = vmatprep.subr.msk.mxu0 %vm139_vm1, %v118_v4  ;;  %v57_v15 = vrot.slane %v751_v0, 7 }
   0x3   :  { %650 = vmatpush3.msk.msra.mxu0 %vm139_vm1, %v118_v4  ;;  %v116_v10 = vld [vmem:[%s917_s0] sm:$0xff]  ;;  %v73_v11 = vrot.slane %v768_v6, 1  ;;  %v74_v12 = vrot.slane %v773_v7, 1  ;;  %v58_v17 = vrot.slane %v756_v1, 7  ;;  %v60_v22 = vrot.slane %v768_v6, 7  ;;  %v305_v39 = vld [vmem:[%s919_s2 + $0x58] sm:$0xff] }
   0x4   :  { %v72_v5 = vsel %vm69_vm0, %v70_v2, %v71_v3  ;;  %v78_v9 = vsel %vm69_vm0, %v71_v3, 0.0  ;;  %651 = vmatprep.subr.mxu0 %v117_v8  ;;  %v67_v16 = vsel %vm56_vm2, 0.0, %v57_v15  ;;  %v61_v28 = vrot.slane %v773_v7, 7  ;;  %v304_v40 = vld [vmem:[%s919_s2 + $0x50] sm:$0xff]  ;;  %661 = vmatprep.subr.mxu1 %v305_v39  ;;  %v303_v41 = vld [vmem:[%s919_s2 + $0x48] sm:$0xff]  ;;  %v302_v42 = vld [vmem:[%s919_s2 + $0x40] sm:$0xff] }
   0x5   :  { %94 = vrot.lane.b32.xlu1 %v72_v5, %s705_s14  ;;  %652 = vmatpush3.msra.mxu0 %v117_v8  ;;  %v75_v13 = vsel %vm69_vm0, %v73_v11, %v74_v12  ;;  %v79_v14 = vsel %vm69_vm0, %v74_v12, 0.0  ;;  %v59_v20 = vsel %vm56_vm2, %v57_v15, %v58_v17  ;;  %v68_v27 = vsel %vm56_vm2, 0.0, %v60_v22  ;;  %v301_v43 = vld [vmem:[%s919_s2 + $0x38] sm:$0xff]  ;;  %v300_v44 = vld [vmem:[%s919_s2 + $0x30] sm:$0xff]  ;;  %v299_v45 = vld [vmem:[%s919_s2 + $0x28] sm:$0xff] }
   0x6   :  { %82 = vrot.lane.b32.xlu0 %v756_v1, %s704_s28  ;;  %653 = vmatprep.subr.mxu0 %v116_v10  ;;  %v62_v33 = vsel %vm56_vm2, %v60_v22, %v61_v28  ;;  %v298_v46 = vld [vmem:[%s919_s2 + $0x20] sm:$0xff]  ;;  %v297_v47 = vld [vmem:[%s919_s2 + $0x18] sm:$0xff]  ;;  %v296_v48 = vld [vmem:[%s919_s2 + $0x10] sm:$0xff]  ;;  %vm427_vm6 = vcmask 1045504   ;;  %vm284_vm7 = vcmask 261120   ;;  %vm289_vm8 = vcmask 523264  }
   0x7   :  { %654 = vmatpush3.msra.mxu0 %v116_v10  ;;  %662 = vmatpush3.msra.mxu1 %v305_v39  ;;  %v411_v49 = vld [vmem:[%s921_s4] sm:$0x3f]  ;;  %v295_v50 = vld [vmem:[%s919_s2 + $0x8] sm:$0xff]  ;;  %vm313_vm9 = vcmask 785408   ;;  %vm588_vm10 = vcmask 130048  }
   0x8   :  { %663 = vmatprep.subr.mxu1 %v304_v40  ;;  %691 = vmatprep.subr.msk.mxu0 %vm427_vm6, %v411_v49  ;;  %v294_v51 = vld [vmem:[%s919_s2] sm:$0xff]  ;;  %s706_s2 = smov 32  }
   0x9   :  { %96 = vrot.lane.b32.xlu1 %v78_v9, %s705_s14  ;;  %664 = vmatpush3.msra.mxu1 %v304_v40  ;;  %v604_v52 = vld [vmem:[%s918_s1] ss:$0 sm:$0xff]  ;;  %s707_s1 = smov 64  }
   0xa   :  { %84 = vrot.lane.b32.xlu0 %v768_v6, %s704_s28  ;;  %665 = vmatprep.subr.mxu1 %v303_v41 }
   0xb   :  { %666 = vmatpush3.msra.mxu1 %v303_v41 }
   0xc   :  { %667 = vmatprep.subr.mxu1 %v302_v42 }
   0xd   :  { %86 = vrot.lane.b32.xlu1 %v773_v7, %s704_s28  ;;  %668 = vmatpush3.msra.mxu1 %v302_v42 }
   0xe   :  { %98 = vrot.lane.b32.xlu0 %v75_v13, %s705_s14  ;;  %669 = vmatprep.subr.mxu1 %v301_v43 }
   0xf   :  { %670 = vmatpush3.msra.mxu1 %v301_v43 }
  0x10   :  { %671 = vmatprep.subr.mxu1 %v300_v44 }
  0x11   :  { %100 = vrot.lane.b32.xlu1 %v79_v14, %s705_s14  ;;  %672 = vmatpush3.msra.mxu1 %v300_v44 }
  0x12   :  { %673 = vmatprep.subr.mxu1 %v299_v45 }
  0x13   :  { %674 = vmatpush3.msra.mxu1 %v299_v45 }
  0x14   :  { %675 = vmatprep.subr.mxu1 %v298_v46 }
  0x15   :  { %676 = vmatpush3.msra.mxu1 %v298_v46 }
  0x16   :  { %677 = vmatprep.subr.mxu1 %v297_v47 }
  0x17   :  { %678 = vmatpush3.msra.mxu1 %v297_v47 }
  0x18   :  { %679 = vmatprep.subr.mxu1 %v296_v48 }
  0x19   :  { %680 = vmatpush3.msra.mxu1 %v296_v48 }
  0x1a   :  { %681 = vmatprep.subr.mxu1 %v295_v50 }
  0x1b   :  { %682 = vmatpush3.msra.mxu1 %v295_v50 }
  0x1c   :  { %683 = vmatprep.subr.mxu1 %v294_v51 }
  0x1d   :  { %684 = vmatpush3.msra.mxu1 %v294_v51 }
  0x74   :  { %v81_v18 = vpop.permute.xlu0 %80 }
  0x75   :  { %v107_v19 = vsel %vm106_vm3, %v67_v16, %v81_v18 }
  0x77   :  { %v95_v21 = vpop.permute.xlu1 %94 }
  0x78   :  { %v83_v23 = vpop.permute.xlu0 %82  ;;  %v112_v24 = vsel %vm111_vm4, %v107_v19, %v95_v21 }
  0x79   :  { %v108_v25 = vsel %vm106_vm3, %v59_v20, %v83_v23  ;;  %655 = vmatprep.mubr.msk.f32.mxu0 %vm126_vm5, %v112_v24 }
  0x7b   :  { %v97_v26 = vpop.permute.xlu1 %96 }
  0x7c   :  { %v113_v29 = vsel %vm111_vm4, %v108_v25, %v97_v26  ;;  %v85_v30 = vpop.permute.xlu0 %84 }
  0x7d   :  { %656 = vmatmul.mubr.msk.f32.vlgmr.msra.gmra.mxu0 %vm126_vm5, %v113_v29  ;;  %v109_v31 = vsel %vm106_vm3, %v68_v27, %v85_v30 }
  0x7e   :  { %692 = vmatpush3.msk.msra.mxu0 %vm427_vm6, %v411_v49 }
  0x7f   :  { %v87_v32 = vpop.permute.xlu1 %86 }
  0x80   :  { %v99_v34 = vpop.permute.xlu0 %98  ;;  %v110_v36 = vsel %vm106_vm3, %v62_v33, %v87_v32 }
  0x81   :  { %v114_v35 = vsel %vm111_vm4, %v109_v31, %v99_v34 }
  0x82   :  { %658 = vmatprep.mubr.msk.f32.mxu0 %vm126_vm5, %v114_v35 }
  0x83   :  { %v101_v37 = vpop.permute.xlu1 %100 }
  0x84   :  { %v115_v38 = vsel %vm111_vm4, %v110_v36, %v101_v37  ;;  %v610_v36 = vld [vmem:[%s920_s3] ss:$0 sm:$0xff] }
  0x85   :  { %659 = vmatmul.mubr.msk.f32.gmra.mxu0 %vm126_vm5, %v115_v38  ;;  %v615_v37 = vld [vmem:[%s922_s5] ss:$0 sm:$0xff] }
  0x86   :  { %693 = vmatprep.mubr.msk.f32.mxu0 %vm106_vm3, %v751_v0 }
  0x89   :  { %694 = vmatmul.mubr.msk.f32.vlgmr.msra.gmra.mxu0 %vm106_vm3, %v756_v1 }
  0x8a   :  { %696 = vmatprep.mubr.msk.f32.mxu0 %vm106_vm3, %v768_v6 }
  0x8d   :  { %697 = vmatmul.mubr.msk.f32.gmra.mxu0 %vm106_vm3, %v773_v7 }
 0x13d   :  { %v657_v53 = vpop.f32.mrf.mxu0 }
 0x13e   :  { %v215_v54 = vadd.f32 %v657_v53, %v604_v52 }
 0x13f   :  { %v209_v55 = vpop.f32.mrf.mxu0 }
 0x140   :  { %v229_v56 = vmax.f32 %v215_v54, 0.0  ;;  %v210_v57 = vadd.f32 %v604_v52, %v209_v55 }
 0x142   :  { %v228_v58 = vmax.f32 %v210_v57, 0.0  ;;  %260 = vrot.lane.b32.xlu1 %v229_v56, %s706_s2  ;;  %v249_v59 = vrot.slane %v229_v56, 1  ;;  %v237_v60 = vrot.slane %v229_v56, 7 }
 0x144   :  { %v236_v61 = vrot.slane %v228_v58, 7  ;;  %v248_v62 = vrot.slane %v228_v58, 1  ;;  %258 = vrot.lane.b32.xlu0 %v228_v58, %s706_s2  ;;  %v256_v63 = vsel %vm69_vm0, %v249_v59, 0.0 }
 0x145   :  { %v660_v0 = vpop.f32.mrf.mxu0 }
 0x146   :  { %v225_v1 = vadd.f32 %v660_v0, %v604_v52  ;;  %274 = vrot.lane.b32.xlu1 %v256_v63, %s707_s1  ;;  %v250_v2 = vsel %vm69_vm0, %v248_v62, %v249_v59  ;;  %v238_v3 = vsel %vm56_vm2, %v236_v61, %v237_v60  ;;  %v246_v18 = vsel %vm56_vm2, 0.0, %v236_v61 }
 0x147   :  { %v219_v4 = vpop.f32.mrf.mxu0 }
 0x148   :  { %v231_v5 = vmax.f32 %v225_v1, 0.0  ;;  %v220_v6 = vadd.f32 %v604_v52, %v219_v4  ;;  %272 = vrot.lane.b32.xlu0 %v250_v2, %s707_s1 }
 0x149   :  { %v695_v33 = vpop.f32.mrf.mxu0 }
 0x14a   :  { %v230_v7 = vmax.f32 %v220_v6, 0.0  ;;  %264 = vrot.lane.b32.xlu1 %v231_v5, %s706_s2  ;;  %v252_v8 = vrot.slane %v231_v5, 1  ;;  %v240_v9 = vrot.slane %v231_v5, 7  ;;  %v503_v41 = vadd.f32 %v695_v33, %v615_v37 }
 0x14b   :  { %v497_v34 = vpop.f32.mrf.mxu0 }
 0x14c   :  { %v239_v10 = vrot.slane %v230_v7, 7  ;;  %v251_v11 = vrot.slane %v230_v7, 1  ;;  %262 = vrot.lane.b32.xlu0 %v230_v7, %s706_s2  ;;  %v257_v12 = vsel %vm69_vm0, %v252_v8, 0.0  ;;  %v498_v38 = vadd.f32 %v615_v37, %v497_v34 }
 0x14d   :  { %v698_v43 = vpop.f32.mrf.mxu0 }
 0x14e   :  { %278 = vrot.lane.b32.xlu1 %v257_v12, %s707_s1  ;;  %v253_v13 = vsel %vm69_vm0, %v251_v11, %v252_v8  ;;  %v241_v14 = vsel %vm56_vm2, %v239_v10, %v240_v9  ;;  %v247_v26 = vsel %vm56_vm2, 0.0, %v239_v10  ;;  %v513_v49 = vadd.f32 %v698_v43, %v615_v37 }
 0x14f   :  { %v507_v48 = vpop.f32.mrf.mxu0 }
 0x150   :  { %276 = vrot.lane.b32.xlu0 %v253_v13, %s707_s1  ;;  %v508_v53 = vadd.f32 %v615_v37, %v507_v48 }
 0x1b4   :  { %v261_v15 = vpop.permute.xlu1 %260 }
 0x1b5   :  { %v286_v21 = vsel %vm284_vm7, %v238_v3, %v261_v15 }
 0x1b6   :  { %v259_v16 = vpop.permute.xlu0 %258 }
 0x1b7   :  { %v285_v19 = vsel %vm284_vm7, %v246_v18, %v259_v16 }
 0x1b8   :  { %v275_v17 = vpop.permute.xlu1 %274 }
 0x1b9   :  { %v291_v23 = vsel %vm289_vm8, %v286_v21, %v275_v17 }
 0x1ba   :  { %v273_v20 = vpop.permute.xlu0 %272 }
 0x1bb   :  { %v290_v22 = vsel %vm289_vm8, %v285_v19, %v273_v20 }
 0x1bc   :  { %v265_v24 = vpop.permute.xlu1 %264  ;;  %685 = vmatprep.mubr.msk.f32.mxu1 %vm313_vm9, %v290_v22 }
 0x1bd   :  { %686 = vmatmul.mubr.msk.f32.vlgmr.msra.gmra.mxu1 %vm313_vm9, %v291_v23  ;;  %v288_v30 = vsel %vm284_vm7, %v241_v14, %v265_v24 }
 0x1be   :  { %v263_v25 = vpop.permute.xlu0 %262 }
 0x1bf   :  { %v287_v28 = vsel %vm284_vm7, %v247_v26, %v263_v25 }
 0x1c0   :  { %v279_v27 = vpop.permute.xlu1 %278 }
 0x1c1   :  { %v293_v32 = vsel %vm289_vm8, %v288_v30, %v279_v27 }
 0x1c2   :  { %v277_v29 = vpop.permute.xlu0 %276 }
 0x1c3   :  { %v292_v31 = vsel %vm289_vm8, %v287_v28, %v277_v29 }
 0x1c4   :  { %688 = vmatprep.mubr.msk.f32.mxu1 %vm313_vm9, %v292_v31 }
 0x1c5   :  { %689 = vmatmul.mubr.msk.f32.gmra.mxu1 %vm313_vm9, %v293_v32 }
 0x27d   :  { %v687_v35 = vpop.f32.mrf.mxu1 }
 0x27e   :  { %v398_v40 = vadd.f32 %v687_v35, %v610_v36 }
 0x27f   :  { %v392_v39 = vpop.f32.mrf.mxu1 }
 0x280   :  { %v393_v42 = vadd.f32 %v610_v36, %v392_v39  ;;  %v517_v45 = vadd.f32 %v503_v41, %v398_v40 }
 0x282   :  { %v516_v44 = vadd.f32 %v498_v38, %v393_v42  ;;  %v521_v51 = vmax.f32 %v517_v45, 0.0 }
 0x284   :  { %v520_v46 = vmax.f32 %v516_v44, 0.0 }
 0x285   :  { %v690_v47 = vpop.f32.mrf.mxu1 }
 0x286   :  { %524 = vxpose.xlu0.b32.start [1/2] (short) (narrow) %v520_v46, 32  ;;  %v408_v52 = vadd.f32 %v690_v47, %v610_v36 }
 0x287   :  { %v402_v50 = vpop.f32.mrf.mxu1 }
 0x288   :  { %v403_v54 = vadd.f32 %v610_v36, %v402_v50  ;;  %v519_v56 = vadd.f32 %v513_v49, %v408_v52 }
 0x28a   :  { %525 = vxpose.xlu0.b32.end [2/2] (short) (narrow) %v521_v51, 32  ;;  %v518_v55 = vadd.f32 %v508_v53, %v403_v54  ;;  %v523_v58 = vmax.f32 %v519_v56, 0.0 }
 0x28c   :  { %v522_v57 = vmax.f32 %v518_v55, 0.0 }
 0x28e   :  { %556 = vxpose.xlu1.b32.start [1/2] (short) (narrow) %v522_v57, 32 }
 0x292   :  { %557 = vxpose.xlu1.b32.end [2/2] (short) (narrow) %v523_v58, 32 }
 0x302   :  { %v540_v59 = vpop.trf.xlu0 }
 0x303   :  { %589 = vst.msk [vmem:[%s924_s7] sm:$0xff] %vm588_vm10, %v540_v59 }
 0x306   :  { %v541_v60 = vpop.trf.xlu0 }
 0x307   :  { %590 = vst.msk [vmem:[%s924_s7 + $0x8] sm:$0xff] %vm588_vm10, %v541_v60 }
 0x30a   :  { %v572_v61 = vpop.trf.xlu1  ;;  %v542_v62 = vpop.trf.xlu0 }
 0x30b   :  { %593 = vst.msk [vmem:[%s924_s7 + $0x20] sm:$0xff] %vm588_vm10, %v572_v61  ;;  %591 = vst.msk [vmem:[%s924_s7 + $0x10] sm:$0xff] %vm588_vm10, %v542_v62 }
 0x30e   :  { %v573_v63 = vpop.trf.xlu1  ;;  %v543_v0 = vpop.trf.xlu0 }
 0x30f   :  { %594 = vst.msk [vmem:[%s924_s7 + $0x28] sm:$0xff] %vm588_vm10, %v573_v63  ;;  %592 = vst.msk [vmem:[%s924_s7 + $0x18] sm:$0xff] %vm588_vm10, %v543_v0 }
 0x312   :  { %v574_v1 = vpop.trf.xlu1 }
 0x313   :  { %595 = vst.msk [vmem:[%s924_s7 + $0x30] sm:$0xff] %vm588_vm10, %v574_v1 }
 0x316   :  { %v575_v2 = vpop.trf.xlu1 }
 0x317   :  { %596 = vst.msk [vmem:[%s924_s7 + $0x38] sm:$0xff] %vm588_vm10, %v575_v2 }

</bundles_post_ra>
